<compile_context>
chip_gen: v5e
topology: v5e:2x2
jax: 0.10.0
libtpu: 0.0.40
codegen_flags: <defaults>
</compile_context>

<pallas_src>
import jax
import jax.numpy as jnp
from jax import lax
from jax.experimental import pallas as pl
from jax.experimental.pallas import tpu as pltpu

CONTEXT_LENGTH = 8
N_EMB = 64
N_HEADS = 8
HEAD_SIZE = N_EMB // N_HEADS  # 8


def _attn_head_kernel(x_ref, w_ref, bias_ref, o_ref):
    # x_ref:    (B*T, E)     bf16   flattened activations (batch in sublanes)
    # w_ref:    (E, 3*H)     bf16   fused [Wq | Wk | Wv]
    # bias_ref: (B*T, B*T)   f32    block-diagonal additive mask
    # o_ref:    (B*T, H)     f32
    H = o_ref.shape[-1]

    # Fused QKV projection: one MXU matmul, f32 accumulation.      (BT, 3H)
    qkv = jnp.dot(x_ref[...], w_ref[...], preferred_element_type=jnp.float32)

    # Slice q/k/v straight off the 2-D result (lane-axis selects, no 3-D
    # reshape that could force a VMEM round-trip).  bf16 operands for the MXU.
    q = qkv[:, 0 * H:1 * H].astype(jnp.bfloat16)                    # (BT, H)
    k = qkv[:, 1 * H:2 * H].astype(jnp.bfloat16)                    # (BT, H)
    v = qkv[:, 2 * H:3 * H].astype(jnp.bfloat16)                    # (BT, H)

    # scores = q @ k^T over the flat (B*T) axis: one 2-D matmul, contracting
    # the shared last axis directly (no transpose materialized).
    # NOTE: the reference module applies NO 1/sqrt(head_size) scaling.
    scores = lax.dot_general(q, k, (((1,), (1,)), ((), ())),
                             preferred_element_type=jnp.float32)    # (BT, BT)
    # Block-diagonal bias: applies masked_fill(tril==0, -inf) within a batch
    # element (finite -1e30, NaN-safe) and kills cross-batch attention.
    scores = scores + bias_ref[...]

    # Numerically stable softmax along the last axis (f32 VPU/EUP math).
    scores = scores - jnp.max(scores, axis=-1, keepdims=True)
    p = jnp.exp(scores)
    p = p * pl.reciprocal(jnp.sum(p, axis=-1, keepdims=True), approx=True)

    # out = p @ v: one (BT,BT)x(BT,H) bf16 matmul, f32 accumulation.
    o_ref[...] = jnp.dot(p.astype(jnp.bfloat16), v,
                         preferred_element_type=jnp.float32)        # (BT, H)


def prepare_attention_params(wq, wk, wv, tril, batch, seq_len):
    """One-time prep (off the hot path): fuse W_qkv and build the bias."""
    T = seq_len
    # Fuse the three PyTorch Linear weights (H, E) into one (E, 3H) bf16 slab.
    w_qkv = jnp.concatenate(
        [jnp.asarray(w, jnp.float32).T for w in (wq, wk, wv)], axis=1
    ).astype(jnp.bfloat16)                                          # (E, 3H)

    # masked_fill(tril==0, -inf) as an additive bias (0 / -1e30), tiled into a
    # block-diagonal (B*T, B*T) matrix; off-diagonal blocks are fully masked
    # so the flat-batch softmax never mixes batch elements.
    tril_bias = jnp.where(jnp.asarray(tril, jnp.float32)[:T, :T] == 0.0,
                          jnp.float32(-1e30), jnp.float32(0.0))     # (T, T)
    within = jnp.kron(jnp.eye(batch, dtype=jnp.float32),
                      jnp.ones((T, T), jnp.float32))                # (BT, BT)
    bias = jnp.where(
        within > 0.0,
        jnp.kron(jnp.ones((batch, batch), jnp.float32), tril_bias),
        jnp.float32(-1e30))                                         # (BT, BT)
    return w_qkv, bias


@jax.jit
def attention_apply(x, w_qkv, bias):
    """Hot path: one pallas_call, no grid, whole arrays resident in VMEM."""
    B, T, E = x.shape
    H = w_qkv.shape[1] // 3
    x_flat = x.astype(jnp.bfloat16).reshape(B * T, E)               # (BT, E)

    out_flat = pl.pallas_call(
        _attn_head_kernel,
        out_shape=jax.ShapeDtypeStruct((B * T, H), jnp.float32),
        in_specs=[
            pl.BlockSpec(memory_space=pltpu.MemorySpace.VMEM),      # x_flat
            pl.BlockSpec(memory_space=pltpu.MemorySpace.VMEM),      # w_qkv
            pl.BlockSpec(memory_space=pltpu.MemorySpace.VMEM),      # bias
        ],
        out_specs=pl.BlockSpec(memory_space=pltpu.MemorySpace.VMEM),
    )(x_flat, w_qkv, bias)
    return out_flat.reshape(B, T, H)


def self_attention_head(x, wq, wk, wv, tril):
    """Convenience wrapper mirroring SelfAttentionHead.forward(x)."""
    B, T, _ = x.shape
    w_qkv, bias = prepare_attention_params(wq, wk, wv, tril, B, T)
    return attention_apply(x, w_qkv, bias)


def _reference(x, wq, wk, wv, tril):
    # Pure f32 JAX reference mirroring the PyTorch module exactly.
    T = x.shape[1]
    q = x @ wq.T
    k = x @ wk.T
    v = x @ wv.T
    scores = q @ jnp.swapaxes(k, -2, -1)
    scores = jnp.where(tril[:T, :T] == 0.0, -jnp.inf, scores)
    scores = jax.nn.softmax(scores, axis=-1)
    return scores @ v


if __name__ == "__main__":
    key = jax.random.PRNGKey(0)
    kx, kq, kk, kv = jax.random.split(key, 4)

    B, T, E, H = 2, CONTEXT_LENGTH, N_EMB, HEAD_SIZE

    x = jax.random.normal(kx, (B, T, E), dtype=jnp.float32)

    # PyTorch Linear-style uniform(-1/sqrt(in), 1/sqrt(in)) init.
    bound = 1.0 / (E ** 0.5)
    wq = jax.random.uniform(kq, (H, E), jnp.float32, -bound, bound)
    wk = jax.random.uniform(kk, (H, E), jnp.float32, -bound, bound)
    wv = jax.random.uniform(kv, (H, E), jnp.float32, -bound, bound)

    # register_buffer('tril', torch.ones(...)) -- all ones, as in the module.
    tril = jnp.ones((CONTEXT_LENGTH, CONTEXT_LENGTH), dtype=jnp.float32)

    # One-time prep (weight fusion + mask) kept off the per-call hot path.
    w_qkv, bias = prepare_attention_params(wq, wk, wv, tril, B, T)

    out = jax.block_until_ready(attention_apply(x, w_qkv, bias))
    ref = _reference(x, wq, wk, wv, tril)

    assert out.shape == (B, T, H), out.shape
    # bf16 MXU operands (f32 accumulation) + approx reciprocal -> loosened
    # tolerance vs the pure-f32 reference.
    assert jnp.allclose(out, ref, atol=5e-2, rtol=5e-2), "mismatch vs reference"

    print("KERNEL_OK")
</pallas_src>

<mosaic_0001>
module attributes {stable_mosaic.version = 11 : i64} {
  func.func @_attn_head_kernel(%arg0: memref<16x64xbf16, #tpu.memory_space<vmem>>, %arg1: memref<64x24xbf16, #tpu.memory_space<vmem>>, %arg2: memref<16x16xf32, #tpu.memory_space<vmem>>, %arg3: memref<16x8xf32, #tpu.memory_space<vmem>>) attributes {dimension_semantics = [], scalar_prefetch = 0 : i64, scratch_operands = 0 : i64, tpu.core_type = #tpu.core_type<tc>} {
    %c0 = arith.constant 0 : index
    %c0_0 = arith.constant 0 : index
    %0 = vector.load %arg0[%c0, %c0_0] : memref<16x64xbf16, #tpu.memory_space<vmem>>, vector<16x64xbf16>
    %c0_1 = arith.constant 0 : index
    %c0_2 = arith.constant 0 : index
    %1 = vector.load %arg1[%c0_1, %c0_2] : memref<64x24xbf16, #tpu.memory_space<vmem>>, vector<64x24xbf16>
    %cst = arith.constant dense<0.000000e+00> : vector<16x24xf32>
    %2 = tpu.matmul %0, %1, %cst {dimension_numbers = #tpu.dot_dimension_numbers<[1], [0], [0], [1], [0, 0, 1, 1], [], []>} : vector<16x64xbf16>, vector<64x24xbf16>, vector<16x24xf32> -> vector<16x24xf32>
    %3 = vector.extract_strided_slice %2 {offsets = [0, 0], sizes = [16, 8], strides = [1, 1]} : vector<16x24xf32> to vector<16x8xf32>
    %4 = arith.truncf %3 : vector<16x8xf32> to vector<16x8xbf16>
    %5 = vector.extract_strided_slice %2 {offsets = [0, 8], sizes = [16, 8], strides = [1, 1]} : vector<16x24xf32> to vector<16x8xf32>
    %6 = arith.truncf %5 : vector<16x8xf32> to vector<16x8xbf16>
    %7 = vector.extract_strided_slice %2 {offsets = [0, 16], sizes = [16, 8], strides = [1, 1]} : vector<16x24xf32> to vector<16x8xf32>
    %8 = arith.truncf %7 : vector<16x8xf32> to vector<16x8xbf16>
    %cst_3 = arith.constant dense<0.000000e+00> : vector<16x16xf32>
    %9 = tpu.matmul %4, %6, %cst_3 {dimension_numbers = #tpu.dot_dimension_numbers<[1], [1], [0], [0], [0, 0, 1, 0], [], []>} : vector<16x8xbf16>, vector<16x8xbf16>, vector<16x16xf32> -> vector<16x16xf32>
    %c0_4 = arith.constant 0 : index
    %c0_5 = arith.constant 0 : index
    %10 = vector.load %arg2[%c0_4, %c0_5] : memref<16x16xf32, #tpu.memory_space<vmem>>, vector<16x16xf32>
    %11 = arith.addf %9, %10 : vector<16x16xf32>
    %cst_6 = arith.constant dense<0xFF800000> : vector<16xf32>
    %12 = vector.multi_reduction <maximumf>, %11, %cst_6 [1] : vector<16x16xf32> to vector<16xf32>
    %13 = vector.shape_cast %12 : vector<16xf32> to vector<16x1xf32>
    %14 = vector.broadcast %13 : vector<16x1xf32> to vector<16x16xf32>
    %15 = arith.subf %11, %14 : vector<16x16xf32>
    %16 = math.exp %15 : vector<16x16xf32>
    %cst_7 = arith.constant dense<0.000000e+00> : vector<16xf32>
    %17 = vector.multi_reduction <add>, %16, %cst_7 [1] : vector<16x16xf32> to vector<16xf32>
    %18 = vector.shape_cast %17 : vector<16xf32> to vector<16x1xf32>
    %19 = tpu.reciprocal %18 {approx = true} : vector<16x1xf32> -> vector<16x1xf32>
    %20 = vector.broadcast %19 : vector<16x1xf32> to vector<16x16xf32>
    %21 = arith.mulf %16, %20 : vector<16x16xf32>
    %22 = arith.truncf %21 : vector<16x16xf32> to vector<16x16xbf16>
    %cst_8 = arith.constant dense<0.000000e+00> : vector<16x8xf32>
    %23 = tpu.matmul %22, %8, %cst_8 {dimension_numbers = #tpu.dot_dimension_numbers<[1], [0], [0], [1], [0, 0, 1, 1], [], []>} : vector<16x16xbf16>, vector<16x8xbf16>, vector<16x8xf32> -> vector<16x8xf32>
    %c0_9 = arith.constant 0 : index
    %c0_10 = arith.constant 0 : index
    %24 = vector.load %arg3[%c0_9, %c0_10] : memref<16x8xf32, #tpu.memory_space<vmem>>, vector<16x8xf32>
    tpu.vector_store %arg3[%c0_9, %c0_10], %23 {strides = array<i32>} : memref<16x8xf32, #tpu.memory_space<vmem>>, vector<16x8xf32>,
    return
  }
}

</mosaic_0001>

<bundles_post_ra>
// kernel: attention_apply.1
= control target key start
LH: loop header
LB: loop body
LE: loop exit
PB: predicated region body
PF: predicated region fallthrough
CT: control target
= control target key end

     0   :  { %s289_s0 = inlined_call_operand.vmem [shape: bf16[16,64], index: 0, kind: input, shape index: {}]   ;;  %s290_s1 = inlined_call_operand.vmem [shape: bf16[64,24], index: 1, kind: input, shape index: {}]   ;;  %s291_s2 = inlined_call_operand.vmem [shape: f32[16,16], index: 2, kind: input, shape index: {}]   ;;  %s292_s3 = inlined_call_operand.hbm [shape: f32[16,8], index: 3, kind: output, shape index: {}]  }
   0x1   :  { %v191_v0 = vld [vmem:[%s290_s1 + $0x18] sm:$0xff] }
   0x2   :  { %8 = vsyncpa [#allocation3], 0  ;;  %63 = vmatpush.bf16.msra.mxu0 %v191_v0  ;;  %v190_v1 = vld [vmem:[%s290_s1 + $0x10] sm:$0xff]  ;;  %v189_v2 = vld [vmem:[%s290_s1 + $0x8] sm:$0xff]  ;;  %vm55_vm0 = vcmask 523264   ;;  %s231_s22 = smov 120  }
   0x3   :  { %v188_v3 = vld [vmem:[%s290_s1] sm:$0xff]  ;;  %vm79_vm1 = vcmask 64512   ;;  %vm100_vm2 = vcmask 130048   ;;  %v75_v14 = vld [vmem:[%s291_s2 + $0x8] sm:$0xff]  ;;  %s233_s25 = smov [#allocation2]   ;;  %s152_s29 = sshll.u32 %s292_s3, 4  ;;  %s153_s29 = int_to_ptr.hbm [resolvable:$true] %s152_s29 }
   0x4   :  { %v187_v4 = vld [vmem:[%s289_s0] sm:$0xff]  ;;  %s150_s26 = sshll.u32 %s233_s25, 4  ;;  %s234_s30 = smov 128   ;;  %s151_s26 = int_to_ptr.vmem [resolvable:$true] %s150_s26 }
   0x5   :  { %v74_v10 = vld [vmem:[%s291_s2] sm:$0xff]  ;;  %s232_s2 = smov 112   ;;  %s235_s4 = smov 8  }
   0x6   :  { %64 = vmatpush.bf16.msra.mxu0 %v190_v1 }
   0xa   :  { %65 = vmatpush.bf16.msra.mxu0 %v189_v2 }
   0xe   :  { %66 = vmatpush.bf16.msra.mxu0 %v188_v3 }
  0x11   :  { %184 = vmatmul.msk.bf16.vlgmr.msra.gmra.mxu0 %vm55_vm0, %v187_v4 }
  0x8e   :  { %v68_v5 = vpop.f32.mrf.mxu0 }
  0x96   :  { %v70_v6 = vpop.f32.mrf.mxu0 }
  0x97   :  { %v73_v7 = vpack.c.bf16 %v70_v6, %v68_v5 }
  0x99   :  { %77 = vrot.lane.b32.xlu0 %v73_v7, %s231_s22 }
 0x10b   :  { %v78_v8 = vpop.permute.xlu0 %77 }
 0x10c   :  { %v84_v9 = vsel %vm79_vm1, %v78_v8, 0 }
 0x10d   :  { %93 = vmatpush.bf16.xpose.msra.mxu1 %v84_v9 }
 0x114   :  { %185 = vmatmul.msk.bf16.vlgmr.msra.gmra.mxu1 %vm79_vm1, %v73_v7 }
 0x191   :  { %v95_v11 = vpop.f32.mrf.mxu1 }
 0x192   :  { %v96_v12 = vadd.f32 %v95_v11, %v74_v10 }
 0x194   :  { %v101_v13 = vsel %vm100_vm2, %v96_v12, -inf }
 0x195   :  { %102 = vmax.xlane.f32.xlu0 %v101_v13 }
 0x199   :  { %v97_v15 = vpop.f32.mrf.mxu1 }
 0x19a   :  { %v98_v16 = vadd.f32 %v97_v15, %v75_v14 }
 0x19c   :  { %v104_v17 = vsel %vm100_vm2, %v98_v16, -inf }
 0x19d   :  { %105 = vmax.xlane.f32.xlu1 %v104_v17 }
 0x208   :  { %v103_v18 = vpop.xlane.xlu0 %102 }
 0x209   :  { %v107_v19 = vsub.f32 %v96_v12, %v103_v18 }
 0x20b   :  { %v109_v20 = vmul.f32 1.442695, %v107_v19 }
 0x20d   :  { %197 = vpow2.f32 %v109_v20 }
 0x210   :  { %v106_v21 = vpop.xlane.xlu1 %105 }
 0x211   :  { %v108_v22 = vsub.f32 %v98_v16, %v106_v21 }
 0x213   :  { %v198_v23 = vpop.eup %197  ;;  %v111_v24 = vmul.f32 1.442695, %v108_v22 }
 0x214   :  { %v113_v25 = vsel %vm100_vm2, %v198_v23, 0.0 }
 0x215   :  { %199 = vpow2.f32 %v111_v24  ;;  %114 = vadd.xlane.f32.xlu1 %v113_v25 }
 0x21b   :  { %v200_v26 = vpop.eup %199 }
 0x21c   :  { %v116_v27 = vsel %vm100_vm2, %v200_v26, 0.0 }
 0x21d   :  { %117 = vadd.xlane.f32.xlu2 %v116_v27 }
 0x235   :  { %124 = vrot.lane.b32.xlu2 %v73_v7, %s232_s2 }
 0x288   :  { %v115_v28 = vpop.xlane.xlu1 %114 }
 0x289   :  { %201 = vrcp.f32 %v115_v28 }
 0x28f   :  { %v202_v30 = vpop.eup %201 }
 0x290   :  { %v118_v29 = vpop.xlane.xlu2 %117  ;;  %v121_v33 = vmul.f32 %v202_v30, %v198_v23 }
 0x291   :  { %203 = vrcp.f32 %v118_v29 }
 0x297   :  { %v204_v31 = vpop.eup %203 }
 0x298   :  { %v125_v32 = vpop.permute.xlu2 %124  ;;  %v122_v34 = vmul.f32 %v204_v31, %v200_v26 }
 0x299   :  { %137 = vmatpush.bf16.msra.mxu2 %v125_v32 }
 0x29a   :  { %v123_v35 = vpack.c.bf16 %v122_v34, %v121_v33 }
 0x29c   :  { %186 = vmatmul.msk.bf16.vlgmr.msra.gmra.mxu2 %vm100_vm2, %v123_v35 }
 0x31f   :  { %v139_v36 = vpop.f32.mrf.mxu2 }
 0x320   :  { %144 = vst.msk [vmem:[#allocation2] sm:$0xff] %vm79_vm1, %v139_v36 }
 0x327   :  { %v141_v37 = vpop.f32.mrf.mxu2 }
 0x328   :  { %145 = vst.msk [vmem:[#allocation2 + $0x8] sm:$0xff] %vm79_vm1, %v141_v37 }
 0x329   :  { %158 = dma.vmem_to_hbm [thread:$0]  %s151_s26, 256, %s153_s29, [#allocation3], %s234_s30, %s234_s30, %s235_s4  }
 0x32a   :  { %229 = dma.done.wait [#allocation3], 256  }
 0x32b   :  { %230 = vsyncadd [#allocation3], 4294967040 }
 0x32c   :  { %163 = vsyncpa [#allocation3], 1 }

</bundles_post_ra>
